<compile_context>
chip_gen: v7x
topology: tpu7x:2x2x1
jax: 0.10.0
libtpu: 0.0.40
codegen_flags: <defaults>
</compile_context>

<pallas_src>
import math

import jax
import jax.numpy as jnp
from jax.experimental import pallas as pl
from jax.experimental.pallas import tpu as pltpu
from jax.scipy.linalg import block_diag


def _round_up(n, m):
    return ((n + m - 1) // m) * m


def _multi_modal_kernel(
    xg_ref, xs_ref, xe_ref,     # (TB, D) pooled encoder outputs per modality
    w1_ref, b1_ref,             # fused block-diag layer 1: (4D, 3L+D), (1, 3L+D) f32 bias
    w2_ref, b2_ref,             # fused block-diag layer 2 (lane-padded): (3L+D, OUTW), (1, OUTW)
    fw_ref,                     # (3,) WeightFusion scalar weights, SMEM
    fb_ref,                     # (1, D) WeightFusion bias, f32
    out_ref,                    # (TB, OUTW) = [cl_gnn | cl_seq | cl_geo | pred | 0-pad]
):
    xg = xg_ref[...]
    xs = xs_ref[...]
    xe = xe_ref[...]
    wdt = w1_ref.dtype                   # matmul operand dtype (f32 or bf16)

    # ---- F.normalize(p=2, dim=1) per modality + WeightFusion (f32 math) ----
    def norm_scaled(xi, w):
        xf = xi.astype(jnp.float32)
        ss = jnp.sum(xf * xf, axis=1, keepdims=True)
        # rsqrt(max(ss, 1e-24)) == 1 / max(||x||, 1e-12)  (matches F.normalize eps)
        inv = jax.lax.rsqrt(jnp.maximum(ss, 1e-24))
        return xf * (inv * w)

    emb = (norm_scaled(xg, fw_ref[0])
           + norm_scaled(xs, fw_ref[1])
           + norm_scaled(xe, fw_ref[2])
           + fb_ref[...])
    # TODO(synk): nn.Dropout is identity in eval mode; no stochastic dropout here.

    # ---- assemble the (TB, 3D+D) operand in VMEM (lane concat, no HBM pass) ----
    a = jnp.concatenate(
        [xg.astype(wdt), xs.astype(wdt), xe.astype(wdt), emb.astype(wdt)], axis=1)

    # ---- two fused block-diagonal matmuls cover all four Linear layers ------
    #   layer 1: pro_gnn[0] | pro_seq[0] | pro_geo[0] | output_layer[0]  -> ReLU
    #   layer 2: pro_gnn[2] | pro_seq[2] | pro_geo[2] | output_layer[3]
    h = jnp.dot(a, w1_ref[...], preferred_element_type=jnp.float32) + b1_ref[...]
    h = jnp.maximum(h, 0.0)
    out = jnp.dot(h.astype(wdt), w2_ref[...],
                  preferred_element_type=jnp.float32) + b2_ref[...]
    out_ref[...] = out.astype(out_ref.dtype)     # single lane-dense 128-wide store


def prepare_fused_params(params, *, matmul_dtype=jnp.float32):
    """Build the fused block-diagonal weights ONCE (at model-load time).

    Re-emitting block_diag / pad / concat every forward call dominated latency
    at these weight sizes, so it is hoisted out of the per-call path.
    """
    D = params["wg1"].shape[0]
    L = params["wg2"].shape[1]
    O = params["wo2"].shape[1]
    OUTW = _round_up(3 * L + O, 128)     # lane-dense merged output slab width

    w1 = block_diag(params["wg1"], params["ws1"], params["we1"], params["wo1"])
    b1 = jnp.concatenate(
        [params["bg1"], params["bs1"], params["be1"], params["bo1"]], axis=1)
    w2 = block_diag(params["wg2"], params["ws2"], params["we2"], params["wo2"])
    w2 = jnp.pad(w2, ((0, 0), (0, OUTW - (3 * L + O))))
    b2 = jnp.pad(
        jnp.concatenate([params["bg2"], params["bs2"], params["be2"],
                         params["bo2"]], axis=1),
        ((0, 0), (0, OUTW - (3 * L + O))))

    return dict(
        D=D, L=L, O=O, OUTW=OUTW,
        x_dtype=matmul_dtype,            # stream inputs in the matmul dtype
        w1=w1.astype(matmul_dtype),
        b1=b1.astype(jnp.float32),       # biases stay f32 (added post f32 acc)
        w2=w2.astype(matmul_dtype),
        b2=b2.astype(jnp.float32),
        fw=params["fusion_w"].reshape(3).astype(jnp.float32),
        fb=params["fusion_b"].astype(jnp.float32),
    )


def multi_modal_forward(x_gnn, x_seq, x_geo, fused, *, tile_b=2048):
    """Multi_modal post-encoder forward. Returns (cl_list, pred).

    tile_b: batch-tile target. 2048 is a good default for v5e/v6e; raise to
    ~4096 on v7x (double-buffered tiles stay far below VMEM on all gens).
    """
    B, D = x_gnn.shape
    assert D == fused["D"]
    L, O, OUTW = fused["L"], fused["O"], fused["OUTW"]
    x_dtype = fused["x_dtype"]

    # Batch tile with bounded padding: at most 8*num_tiles padded rows instead
    # of up to (TILE_B - 1).
    num_tiles = -(-B // int(tile_b))
    TILE_B = _round_up(-(-B // num_tiles), 8)
    Bp = num_tiles * TILE_B

    def prep(x):
        x = x.astype(x_dtype)
        if Bp != B:
            x = jnp.pad(x, ((0, Bp - B), (0, 0)))
        return x

    xg, xs, xe = prep(x_gnn), prep(x_seq), prep(x_geo)

    x_spec = pl.BlockSpec((TILE_B, D), lambda i: (i, 0))     # batch-tiled stream

    def resident(a):
        # constant block index -> DMA'd once, stays resident across the grid
        return pl.BlockSpec(a.shape, lambda i: (0, 0))

    in_specs = [
        x_spec, x_spec, x_spec,
        resident(fused["w1"]), resident(fused["b1"]),
        resident(fused["w2"]), resident(fused["b2"]),
        pl.BlockSpec((3,), lambda i: (0,),
                     memory_space=pltpu.MemorySpace.SMEM),   # fusion scalars
        resident(fused["fb"]),
    ]
    out_specs = pl.BlockSpec((TILE_B, OUTW), lambda i: (i, 0))
    out_shape = jax.ShapeDtypeStruct((Bp, OUTW), jnp.float32)

    # Explicit VMEM budget: resident weights + double-buffered batch tiles.
    def nbytes(a):
        return int(a.size) * a.dtype.itemsize

    weight_bytes = sum(nbytes(fused[k]) for k in ("w1", "b1", "w2", "b2", "fb"))
    tile_bytes = TILE_B * (3 * D * jnp.dtype(x_dtype).itemsize + OUTW * 4)
    vmem_limit = int(min(48 * 2**20,
                         max(4 * 2**20, 2 * (weight_bytes + tile_bytes) + (2 << 20))))

    out = pl.pallas_call(
        _multi_modal_kernel,
        grid=(num_tiles,),
        out_shape=out_shape,
        in_specs=in_specs,
        out_specs=out_specs,
        compiler_params=pltpu.CompilerParams(
            dimension_semantics=("parallel",),   # megacore-shard batch grid (v7x)
            vmem_limit_bytes=vmem_limit,
        ),
    )(xg, xs, xe, fused["w1"], fused["b1"], fused["w2"], fused["b2"],
      fused["fw"], fused["fb"])

    out = out[:B]
    cl_list = [out[:, 0:L], out[:, L:2 * L], out[:, 2 * L:3 * L]]
    pred = out[:, 3 * L:3 * L + O]
    return cl_list, pred


def _linear_init(key, fan_in, fan_out):
    """PyTorch nn.Linear default init (kaiming_uniform a=sqrt(5) + uniform bias)."""
    kw, kb = jax.random.split(key)
    bound_w = math.sqrt(1.0 / fan_in) * math.sqrt(3.0)
    w = jax.random.uniform(kw, (fan_in, fan_out), jnp.float32, -bound_w, bound_w)
    bound_b = 1.0 / math.sqrt(fan_in)
    b = jax.random.uniform(kb, (1, fan_out), jnp.float32, -bound_b, bound_b)
    return w, b


def make_params(key, D, L, O):
    keys = jax.random.split(key, 10)
    wg1, bg1 = _linear_init(keys[0], D, L)
    wg2, bg2 = _linear_init(keys[1], L, L)
    ws1, bs1 = _linear_init(keys[2], D, L)
    ws2, bs2 = _linear_init(keys[3], L, L)
    we1, be1 = _linear_init(keys[4], D, L)
    we2, be2 = _linear_init(keys[5], L, L)
    # WeightFusion: weight shape (1,1,3) kaiming_uniform(a=sqrt(5)), bias (D,)
    fan_in = 3
    bw = math.sqrt(1.0 / fan_in) * math.sqrt(3.0)
    fusion_w = jax.random.uniform(keys[6], (1, 3), jnp.float32, -bw, bw)
    bb = 1.0 / math.sqrt(fan_in)
    fusion_b = jax.random.uniform(keys[7], (1, D), jnp.float32, -bb, bb)
    wo1, bo1 = _linear_init(keys[8], D, D)
    wo2, bo2 = _linear_init(keys[9], D, O)
    return dict(
        wg1=wg1, bg1=bg1, wg2=wg2, bg2=bg2,
        ws1=ws1, bs1=bs1, ws2=ws2, bs2=bs2,
        we1=we1, be1=be1, we2=we2, be2=be2,
        fusion_w=fusion_w, fusion_b=fusion_b,
        wo1=wo1, bo1=bo1, wo2=wo2, bo2=bo2,
    )


if __name__ == "__main__":
    # batch B=8, hidden_dim D=32 (= cfg.MODEL.HID = seq_hidden_dim = geo_hidden_dim,
    # so fusion_dim = 3*32/3 = 32), latent_dim L=32, output_dim O=8.
    B, D, L, O = 8, 32, 32, 8
    key = jax.random.PRNGKey(0)
    k_x, k_p = jax.random.split(key)
    kg, ks, ke = jax.random.split(k_x, 3)

    # TODO(synk): HiGNN / TrfmSeq2seq / GeoGNNModel encoders and GlobalAttention
    # pooling are external sub-modules; their pooled outputs are modeled as inputs.
    x_gnn = jax.random.normal(kg, (B, D), jnp.float32)
    x_seq = jax.random.normal(ks, (B, D), jnp.float32)
    x_geo = jax.random.normal(ke, (B, D), jnp.float32)

    params = make_params(k_p, D, L, O)
    fused = prepare_fused_params(params)        # built ONCE at model-load time

    cl_list, pred = multi_modal_forward(x_gnn, x_seq, x_geo, fused)
    jax.block_until_ready(pred)
    for c in cl_list:
        jax.block_until_ready(c)

    # ---- pure-JAX reference ----
    def ref_proj(x, w1, b1, w2, b2):
        return jnp.maximum(x @ w1 + b1, 0.0) @ w2 + b2

    def ref_norm(x):
        return x / jnp.maximum(jnp.linalg.norm(x, axis=1, keepdims=True), 1e-12)

    emb_ref = (ref_norm(x_gnn) * params["fusion_w"][0, 0]
               + ref_norm(x_seq) * params["fusion_w"][0, 1]
               + ref_norm(x_geo) * params["fusion_w"][0, 2]
               + params["fusion_b"])
    pred_ref = (jnp.maximum(emb_ref @ params["wo1"] + params["bo1"], 0.0)
                @ params["wo2"] + params["bo2"])
    cl_refs = [
        ref_proj(x_gnn, params["wg1"], params["bg1"], params["wg2"], params["bg2"]),
        ref_proj(x_seq, params["ws1"], params["bs1"], params["ws2"], params["bs2"]),
        ref_proj(x_geo, params["we1"], params["be1"], params["we2"], params["be2"]),
    ]

    assert jnp.allclose(pred, pred_ref, atol=1e-4), "pred mismatch"
    for got, want in zip(cl_list, cl_refs):
        assert jnp.allclose(got, want, atol=1e-4), "cl mismatch"

    # Optional bf16 streaming path (bf16 inputs + bf16 matmul operands, f32
    # accumulation and f32 normalize/fusion) — loose check only.
    fused_bf = prepare_fused_params(params, matmul_dtype=jnp.bfloat16)
    cl_bf, pred_bf = multi_modal_forward(x_gnn, x_seq, x_geo, fused_bf)
    jax.block_until_ready(pred_bf)
    assert bool(jnp.isfinite(pred_bf).all()), "bf16 pred not finite"
    assert float(jnp.max(jnp.abs(pred_bf - pred_ref))) < 0.25, "bf16 pred far off"

    print("KERNEL_OK")
</pallas_src>

<mosaic_0001>
module attributes {stable_mosaic.version = 11 : i64} {
  func.func @_multi_modal_kernel(%arg0: i32, %arg1: memref<8x32xf32, #tpu.memory_space<vmem>>, %arg2: memref<8x32xf32, #tpu.memory_space<vmem>>, %arg3: memref<8x32xf32, #tpu.memory_space<vmem>>, %arg4: memref<128x128xf32, #tpu.memory_space<vmem>>, %arg5: memref<1x128xf32, #tpu.memory_space<vmem>>, %arg6: memref<128x128xf32, #tpu.memory_space<vmem>>, %arg7: memref<1x128xf32, #tpu.memory_space<vmem>>, %arg8: memref<3xf32, #tpu.memory_space<smem>>, %arg9: memref<1x32xf32, #tpu.memory_space<vmem>>, %arg10: memref<8x128xf32, #tpu.memory_space<vmem>>) attributes {dimension_semantics = [#tpu.dimension_semantics<parallel>], iteration_bounds = array<i64: 1>, scalar_prefetch = 0 : i64, scratch_operands = 0 : i64, tpu.core_type = #tpu.core_type<tc>, window_params = [{transform_indices = @transform_0, window_bounds = array<i64: 8, 32>}, {transform_indices = @transform_1, window_bounds = array<i64: 8, 32>}, {transform_indices = @transform_2, window_bounds = array<i64: 8, 32>}, {pipeline_mode = #tpu.pipeline_mode<synchronous>, transform_indices = @transform_3, window_bounds = array<i64: 128, 128>}, {pipeline_mode = #tpu.pipeline_mode<synchronous>, transform_indices = @transform_4, window_bounds = array<i64: 1, 128>}, {pipeline_mode = #tpu.pipeline_mode<synchronous>, transform_indices = @transform_5, window_bounds = array<i64: 128, 128>}, {pipeline_mode = #tpu.pipeline_mode<synchronous>, transform_indices = @transform_6, window_bounds = array<i64: 1, 128>}, {transform_indices = @transform_7, window_bounds = array<i64: 3>}, {pipeline_mode = #tpu.pipeline_mode<synchronous>, transform_indices = @transform_8, window_bounds = array<i64: 1, 32>}, {transform_indices = @transform_9, window_bounds = array<i64: 8, 128>}]} {
    %c0 = arith.constant 0 : index
    %c0_0 = arith.constant 0 : index
    %0 = vector.load %arg1[%c0, %c0_0] : memref<8x32xf32, #tpu.memory_space<vmem>>, vector<8x32xf32>
    %c0_1 = arith.constant 0 : index
    %c0_2 = arith.constant 0 : index
    %1 = vector.load %arg2[%c0_1, %c0_2] : memref<8x32xf32, #tpu.memory_space<vmem>>, vector<8x32xf32>
    %c0_3 = arith.constant 0 : index
    %c0_4 = arith.constant 0 : index
    %2 = vector.load %arg3[%c0_3, %c0_4] : memref<8x32xf32, #tpu.memory_space<vmem>>, vector<8x32xf32>
    %c0_5 = arith.constant 0 : index
    %3 = memref.load %arg8[%c0_5] : memref<3xf32, #tpu.memory_space<smem>>
    %4 = arith.mulf %0, %0 : vector<8x32xf32>
    %cst = arith.constant dense<0.000000e+00> : vector<8xf32>
    %5 = vector.multi_reduction <add>, %4, %cst [1] : vector<8x32xf32> to vector<8xf32>
    %6 = vector.shape_cast %5 : vector<8xf32> to vector<8x1xf32>
    %cst_6 = arith.constant 1.000000e-24 : f32
    %7 = vector.broadcast %cst_6 : f32 to vector<8x1xf32>
    %8 = arith.maximumf %6, %7 : vector<8x1xf32>
    %9 = math.rsqrt %8 : vector<8x1xf32>
    %10 = vector.broadcast %3 : f32 to vector<8x1xf32>
    %11 = arith.mulf %9, %10 : vector<8x1xf32>
    %12 = vector.broadcast %11 : vector<8x1xf32> to vector<8x32xf32>
    %13 = arith.mulf %0, %12 : vector<8x32xf32>
    %c1 = arith.constant 1 : index
    %14 = memref.load %arg8[%c1] : memref<3xf32, #tpu.memory_space<smem>>
    %15 = arith.mulf %1, %1 : vector<8x32xf32>
    %cst_7 = arith.constant dense<0.000000e+00> : vector<8xf32>
    %16 = vector.multi_reduction <add>, %15, %cst_7 [1] : vector<8x32xf32> to vector<8xf32>
    %17 = vector.shape_cast %16 : vector<8xf32> to vector<8x1xf32>
    %cst_8 = arith.constant 1.000000e-24 : f32
    %18 = vector.broadcast %cst_8 : f32 to vector<8x1xf32>
    %19 = arith.maximumf %17, %18 : vector<8x1xf32>
    %20 = math.rsqrt %19 : vector<8x1xf32>
    %21 = vector.broadcast %14 : f32 to vector<8x1xf32>
    %22 = arith.mulf %20, %21 : vector<8x1xf32>
    %23 = vector.broadcast %22 : vector<8x1xf32> to vector<8x32xf32>
    %24 = arith.mulf %1, %23 : vector<8x32xf32>
    %25 = arith.addf %13, %24 : vector<8x32xf32>
    %c2 = arith.constant 2 : index
    %26 = memref.load %arg8[%c2] : memref<3xf32, #tpu.memory_space<smem>>
    %27 = arith.mulf %2, %2 : vector<8x32xf32>
    %cst_9 = arith.constant dense<0.000000e+00> : vector<8xf32>
    %28 = vector.multi_reduction <add>, %27, %cst_9 [1] : vector<8x32xf32> to vector<8xf32>
    %29 = vector.shape_cast %28 : vector<8xf32> to vector<8x1xf32>
    %cst_10 = arith.constant 1.000000e-24 : f32
    %30 = vector.broadcast %cst_10 : f32 to vector<8x1xf32>
    %31 = arith.maximumf %29, %30 : vector<8x1xf32>
    %32 = math.rsqrt %31 : vector<8x1xf32>
    %33 = vector.broadcast %26 : f32 to vector<8x1xf32>
    %34 = arith.mulf %32, %33 : vector<8x1xf32>
    %35 = vector.broadcast %34 : vector<8x1xf32> to vector<8x32xf32>
    %36 = arith.mulf %2, %35 : vector<8x32xf32>
    %37 = arith.addf %25, %36 : vector<8x32xf32>
    %c0_11 = arith.constant 0 : index
    %c0_12 = arith.constant 0 : index
    %38 = vector.load %arg9[%c0_11, %c0_12] : memref<1x32xf32, #tpu.memory_space<vmem>>, vector<1x32xf32>
    %39 = vector.broadcast %38 : vector<1x32xf32> to vector<8x32xf32>
    %40 = arith.addf %37, %39 : vector<8x32xf32>
    %41 = tpu.concatenate %0, %1, %2, %40 in 1 : vector<8x32xf32>, vector<8x32xf32>, vector<8x32xf32>, vector<8x32xf32> -> vector<8x128xf32>
    %c0_13 = arith.constant 0 : index
    %c0_14 = arith.constant 0 : index
    %42 = vector.load %arg4[%c0_13, %c0_14] : memref<128x128xf32, #tpu.memory_space<vmem>>, vector<128x128xf32>
    %cst_15 = arith.constant dense<0.000000e+00> : vector<8x128xf32>
    %43 = tpu.matmul %41, %42, %cst_15 {dimension_numbers = #tpu.dot_dimension_numbers<[1], [0], [0], [1], [0, 0, 1, 1], [], []>} : vector<8x128xf32>, vector<128x128xf32>, vector<8x128xf32> -> vector<8x128xf32>
    %c0_16 = arith.constant 0 : index
    %c0_17 = arith.constant 0 : index
    %44 = vector.load %arg5[%c0_16, %c0_17] : memref<1x128xf32, #tpu.memory_space<vmem>>, vector<1x128xf32>
    %45 = vector.broadcast %44 : vector<1x128xf32> to vector<8x128xf32>
    %46 = arith.addf %43, %45 : vector<8x128xf32>
    %cst_18 = arith.constant 0.000000e+00 : f32
    %47 = vector.broadcast %cst_18 : f32 to vector<8x128xf32>
    %48 = arith.maximumf %46, %47 : vector<8x128xf32>
    %c0_19 = arith.constant 0 : index
    %c0_20 = arith.constant 0 : index
    %49 = vector.load %arg6[%c0_19, %c0_20] : memref<128x128xf32, #tpu.memory_space<vmem>>, vector<128x128xf32>
    %cst_21 = arith.constant dense<0.000000e+00> : vector<8x128xf32>
    %50 = tpu.matmul %48, %49, %cst_21 {dimension_numbers = #tpu.dot_dimension_numbers<[1], [0], [0], [1], [0, 0, 1, 1], [], []>} : vector<8x128xf32>, vector<128x128xf32>, vector<8x128xf32> -> vector<8x128xf32>
    %c0_22 = arith.constant 0 : index
    %c0_23 = arith.constant 0 : index
    %51 = vector.load %arg7[%c0_22, %c0_23] : memref<1x128xf32, #tpu.memory_space<vmem>>, vector<1x128xf32>
    %52 = vector.broadcast %51 : vector<1x128xf32> to vector<8x128xf32>
    %53 = arith.addf %50, %52 : vector<8x128xf32>
    %c0_24 = arith.constant 0 : index
    %c0_25 = arith.constant 0 : index
    %54 = vector.load %arg10[%c0_24, %c0_25] : memref<8x128xf32, #tpu.memory_space<vmem>>, vector<8x128xf32>
    tpu.vector_store %arg10[%c0_24, %c0_25], %53 {strides = array<i32>} : memref<8x128xf32, #tpu.memory_space<vmem>>, vector<8x128xf32>,
    return
  }
  func.func @transform_0(%arg0: i32) -> (i32, i32) {
    %c0_i32 = arith.constant 0 : i32
    %c0_i32_0 = arith.constant 0 : i32
    return %arg0, %c0_i32 : i32, i32
  }
  func.func @transform_1(%arg0: i32) -> (i32, i32) {
    %c0_i32 = arith.constant 0 : i32
    %c0_i32_0 = arith.constant 0 : i32
    return %arg0, %c0_i32 : i32, i32
  }
  func.func @transform_2(%arg0: i32) -> (i32, i32) {
    %c0_i32 = arith.constant 0 : i32
    %c0_i32_0 = arith.constant 0 : i32
    return %arg0, %c0_i32 : i32, i32
  }
  func.func @transform_3(%arg0: i32) -> (i32, i32) {
    %c0_i32 = arith.constant 0 : i32
    %c0_i32_0 = arith.constant 0 : i32
    %c0_i32_1 = arith.constant 0 : i32
    return %c0_i32, %c0_i32_0 : i32, i32
  }
  func.func @transform_4(%arg0: i32) -> (i32, i32) {
    %c0_i32 = arith.constant 0 : i32
    %c0_i32_0 = arith.constant 0 : i32
    %c0_i32_1 = arith.constant 0 : i32
    return %c0_i32, %c0_i32_0 : i32, i32
  }
  func.func @transform_5(%arg0: i32) -> (i32, i32) {
    %c0_i32 = arith.constant 0 : i32
    %c0_i32_0 = arith.constant 0 : i32
    %c0_i32_1 = arith.constant 0 : i32
    return %c0_i32, %c0_i32_0 : i32, i32
  }
  func.func @transform_6(%arg0: i32) -> (i32, i32) {
    %c0_i32 = arith.constant 0 : i32
    %c0_i32_0 = arith.constant 0 : i32
    %c0_i32_1 = arith.constant 0 : i32
    return %c0_i32, %c0_i32_0 : i32, i32
  }
  func.func @transform_7(%arg0: i32) -> i32 {
    %c0_i32 = arith.constant 0 : i32
    %c0_i32_0 = arith.constant 0 : i32
    return %c0_i32 : i32
  }
  func.func @transform_8(%arg0: i32) -> (i32, i32) {
    %c0_i32 = arith.constant 0 : i32
    %c0_i32_0 = arith.constant 0 : i32
    %c0_i32_1 = arith.constant 0 : i32
    return %c0_i32, %c0_i32_0 : i32, i32
  }
  func.func @transform_9(%arg0: i32) -> (i32, i32) {
    %c0_i32 = arith.constant 0 : i32
    %c0_i32_0 = arith.constant 0 : i32
    return %arg0, %c0_i32 : i32, i32
  }
}

</mosaic_0001>

<bundles_post_ra>
// kernel: tpu_custom_call.1
= control target key start
LH: loop header
LB: loop body
LE: loop exit
PB: predicated region body
PF: predicated region fallthrough
CT: control target
= control target key end

     0   :  { %14 = vsyncpa [#allocation3], 0  ;;  %s907_s0 = inlined_call_operand.hbm [shape: f32[8,32], index: 0, kind: input, shape index: {}]   ;;  %s908_s1 = inlined_call_operand.hbm [shape: f32[8,32], index: 1, kind: input, shape index: {}]   ;;  %s909_s2 = inlined_call_operand.hbm [shape: f32[8,32], index: 2, kind: input, shape index: {}]   ;;  %s910_s3 = inlined_call_operand.hbm [shape: f32[128,128], index: 3, kind: input, shape index: {}]   ;;  %s911_s4 = inlined_call_operand.vmem [shape: f32[1,128], index: 4, kind: input, shape index: {}]   ;;  %s912_s5 = inlined_call_operand.hbm [shape: f32[128,128], index: 5, kind: input, shape index: {}]   ;;  %s913_s6 = inlined_call_operand.vmem [shape: f32[1,128], index: 6, kind: input, shape index: {}]   ;;  %s914_s7 = inlined_call_operand.vmem [shape: f32[3], index: 7, kind: input, shape index: {}]   ;;  %s915_s8 = inlined_call_operand.vmem [shape: f32[1,32], index: 8, kind: input, shape index: {}]   ;;  %s916_s9 = inlined_call_operand.hbm [shape: f32[8,128], index: 9, kind: output, shape index: {}]  }
   0x1   :  { %15 = vsyncpa [#allocation7], 0 }
   0x2   :  { %16 = vsyncpa [#allocation10], 0 }
   0x3   :  { %17 = vsyncpa [#allocation5], 0 }
   0x4   :  { %18 = vsyncpa [#allocation4], 0  ;;  %s707_s30 = smov [#allocation6]   ;;  %s708_s11 = smov [#allocation9]  }
   0x5   :  { %s35_s10 = sshll.u32 %s707_s30, 4  ;;  %s54_s12 = sshll.u32 %s708_s11, 4  ;;  %s36_s10 = int_to_ptr.vmem [resolvable:$true] %s35_s10  ;;  %s772_s12 = int_to_ptr.vmem [resolvable:$true] %s54_s12 }
   0x6   :  { %s553_s15 = scalar_lea.hbm %s908_s1, 128 }
   0x7   :  { %p554_p0 = scmp.ne.s32.totalorder %s908_s1, %s553_s15  ;;  %p557_p1 = scmp.lt.u32.totalorder %s553_s15, %s908_s1 }
   0x9   :  { %p559_p2 = pnand %p557_p1, %p554_p0 }
   0xb   :  { %562 = shalt.err (!%p559_p2)
}
   0xc   :  { %s563_s20 = scalar_lea.vmem %s36_s10, 128  ;;  %p568_p4 = scmp.lt.s32.totalorder %s36_s10, %s36_s10 }
   0xd   :  { %p564_p3 = scmp.ne.s32.totalorder %s36_s10, %s563_s20  ;;  %p569_p5 = scmp.lt.s32.totalorder %s563_s20, %s563_s20 }
   0xf   :  { %p570_p6 = por %p569_p5, %p568_p4 }
  0x11   :  { %p571_p7 = pnand %p570_p6, %p564_p3 }
  0x13   :  { %574 = shalt.err (!%p571_p7)
}
  0x14   :  { %38 = dma.hbm_to_vmem [thread:$0]  %s908_s1, 128, %s36_s10, [#allocation7]  }
  0x15   :  { %s575_s25 = scalar_lea.hbm %s910_s3, 2048 }
  0x16   :  { %p576_p8 = scmp.ne.s32.totalorder %s910_s3, %s575_s25  ;;  %p579_p9 = scmp.lt.u32.totalorder %s575_s25, %s910_s3 }
  0x18   :  { %p581_p10 = pnand %p579_p9, %p576_p8 }
  0x1a   :  { %584 = shalt.err (!%p581_p10)
}
  0x1b   :  { %s585_s30 = scalar_lea.vmem %s772_s12, 2048  ;;  %p590_p12 = scmp.lt.s32.totalorder %s772_s12, %s772_s12 }
  0x1c   :  { %p586_p11 = scmp.ne.s32.totalorder %s772_s12, %s585_s30  ;;  %p591_p13 = scmp.lt.s32.totalorder %s585_s30, %s585_s30 }
  0x1e   :  { %p592_p0 = por %p591_p13, %p590_p12 }
  0x20   :  { %p593_p1 = pnand %p592_p0, %p586_p11 }
  0x22   :  { %596 = shalt.err (!%p593_p1)
}
  0x23   :  { %s709_s1 = smov 128   ;;  %s710_s10 = smov 8  }
  0x24   :  { %60 = dma.hbm_to_vmem [thread:$0]  %s910_s3, 2048, %s772_s12, [#allocation10], %s709_s1, %s709_s1, %s710_s10  }
  0x25   :  { %s711_s14 = smov [#allocation2]   ;;  %s712_s16 = smov [#allocation8]  }
  0x26   :  { %s25_s15 = sshll.u32 %s711_s14, 4  ;;  %s45_s17 = sshll.u32 %s712_s16, 4  ;;  %s26_s15 = int_to_ptr.vmem [resolvable:$true] %s25_s15  ;;  %s46_s17 = int_to_ptr.vmem [resolvable:$true] %s45_s17 }
  0x27   :  { %s597_s20 = scalar_lea.hbm %s907_s0, 128 }
  0x28   :  { %p598_p2 = scmp.ne.s32.totalorder %s907_s0, %s597_s20  ;;  %p601_p3 = scmp.lt.u32.totalorder %s597_s20, %s907_s0 }
  0x2a   :  { %p603_p4 = pnand %p601_p3, %p598_p2 }
  0x2c   :  { %606 = shalt.err (!%p603_p4)
}
  0x2d   :  { %s607_s3 = scalar_lea.vmem %s26_s15, 128  ;;  %p612_p6 = scmp.lt.s32.totalorder %s26_s15, %s26_s15 }
  0x2e   :  { %p608_p5 = scmp.ne.s32.totalorder %s26_s15, %s607_s3  ;;  %p613_p7 = scmp.lt.s32.totalorder %s607_s3, %s607_s3 }
  0x30   :  { %p614_p8 = por %p613_p7, %p612_p6 }
  0x32   :  { %p615_p9 = pnand %p614_p8, %p608_p5 }
  0x34   :  { %618 = shalt.err (!%p615_p9)
}
  0x35   :  { %28 = dma.hbm_to_vmem [thread:$0]  %s907_s0, 128, %s26_s15, [#allocation3]  }
  0x36   :  { %s619_s28 = scalar_lea.hbm %s909_s2, 128 }
  0x37   :  { %p620_p10 = scmp.ne.s32.totalorder %s909_s2, %s619_s28  ;;  %p623_p11 = scmp.lt.u32.totalorder %s619_s28, %s909_s2 }
  0x39   :  { %p625_p12 = pnand %p623_p11, %p620_p10 }
  0x3b   :  { %628 = shalt.err (!%p625_p12)
}
  0x3c   :  { %s629_s14 = scalar_lea.vmem %s46_s17, 128  ;;  %p634_p0 = scmp.lt.s32.totalorder %s46_s17, %s46_s17 }
  0x3d   :  { %p630_p13 = scmp.ne.s32.totalorder %s46_s17, %s629_s14  ;;  %p635_p1 = scmp.lt.s32.totalorder %s629_s14, %s629_s14 }
  0x3f   :  { %p636_p2 = por %p635_p1, %p634_p0 }
  0x41   :  { %p637_p3 = pnand %p636_p2, %p630_p13 }
  0x43   :  { %640 = shalt.err (!%p637_p3)
}
  0x44   :  { %48 = dma.hbm_to_vmem [thread:$0]  %s909_s2, 128, %s46_s17, [#allocation7]  }
  0x45   :  { %s83_s19 = sshll.u32 %s914_s7, 4  ;;  %s713_s20 = smov [#allocation11]   ;;  %s84_s19 = int_to_ptr.vmem [resolvable:$true] %s83_s19 }
  0x46   :  { %s68_s21 = sshll.u32 %s713_s20, 4  ;;  %s641_s24 = scalar_lea.hbm %s912_s5, 2048  ;;  %s69_s21 = int_to_ptr.vmem [resolvable:$true] %s68_s21 }
  0x47   :  { %p642_p4 = scmp.ne.s32.totalorder %s912_s5, %s641_s24  ;;  %p645_p5 = scmp.lt.u32.totalorder %s641_s24, %s912_s5 }
  0x49   :  { %p647_p6 = pnand %p645_p5, %p642_p4 }
  0x4b   :  { %650 = shalt.err (!%p647_p6)
}
  0x4c   :  { %s651_s2 = scalar_lea.vmem %s69_s21, 2048  ;;  %p656_p8 = scmp.lt.s32.totalorder %s69_s21, %s69_s21 }
  0x4d   :  { %p652_p7 = scmp.ne.s32.totalorder %s69_s21, %s651_s2  ;;  %p657_p9 = scmp.lt.s32.totalorder %s651_s2, %s651_s2 }
  0x4f   :  { %p658_p10 = por %p657_p9, %p656_p8 }
  0x51   :  { %p659_p11 = pnand %p658_p10, %p652_p7 }
  0x53   :  { %662 = shalt.err (!%p659_p11)
}
  0x54   :  { %74 = dma.hbm_to_vmem [thread:$0]  %s912_s5, 2048, %s69_s21, [#allocation10], %s709_s1, %s709_s1, %s710_s10  }
  0x55   :  { %s663_s27 = scalar_lea.vmem %s84_s19, 16  ;;  %p668_p13 = scmp.lt.s32.totalorder %s84_s19, %s84_s19 }
  0x56   :  { %p664_p12 = scmp.ne.s32.totalorder %s84_s19, %s663_s27  ;;  %p669_p0 = scmp.lt.s32.totalorder %s663_s27, %s663_s27 }
  0x58   :  { %p670_p1 = por %p669_p0, %p668_p13 }
  0x5a   :  { %p671_p2 = pnand %p670_p1, %p664_p12 }
  0x5c   :  { %674 = shalt.err (!%p671_p2)
}
  0x5d   :  { %s714_s28 = smov [#allocation12]  }
  0x5e   :  { %86 = dma.vmem_to_smem %s84_s19, 16, %s714_s28, [#allocation5]  }
  0x5f   :  { %697 = dma.done.wait [#allocation3], 128  }
  0x60   :  { %698 = vsyncadd [#allocation3], 4294967168 }
  0x61   :  { %699 = dma.done.wait [#allocation7], 256  }
  0x62   :  { %700 = vsyncadd [#allocation7], 4294967040 }
  0x63   :  { %701 = dma.done.wait [#allocation10], 4096  }
  0x64   :  { %702 = vsyncadd [#allocation10], 4294963200 }
  0x65   :  { %703 = dma.done.wait [#allocation5], 16  }
  0x66   :  { %704 = vsyncadd [#allocation5], 4294967280 }
  0x67   :  { %107 = sfence }
  0x68   :  { %v848_v0 = vld [vmem:[#allocation2] sm:$0xff]  ;;  %vm113_vm0 = vcmask 261120   ;;  %v850_v1 = vld [vmem:[#allocation6] sm:$0xff]  ;;  %v852_v2 = vld [vmem:[#allocation8] sm:$0xff]  ;;  %s715_s5 = smov 32   ;;  %s716_s1 = smov 64  }
  0x69   :  { %v112_v3 = vmul.f32 %v848_v0, %v848_v0  ;;  %v123_v4 = vmul.f32 %v850_v1, %v850_v1  ;;  %v134_v5 = vmul.f32 %v852_v2, %v852_v2  ;;  %v169_v9 = vld [vmem:[#allocation9] sm:$0xff]  ;;  %v170_v10 = vld [vmem:[#allocation9 + $0x8] sm:$0xff]  ;;  %v171_v11 = vld [vmem:[#allocation9 + $0x10] sm:$0xff]  ;;  %v717_v12 = vmov 0.0|0.0   ;;  %s111_s10 = sld [smem:[#allocation12]]  ;;  %s376_s29 = sld [smem:[#allocation12 + $0x2]] }
  0x6a   :  { %484 = vmatprep.subr.bf16.mxu0 %v717_v12  ;;  %v485_v13 = vpack.c.bf16 %v170_v10, %v169_v9  ;;  %v172_v14 = vld [vmem:[#allocation9 + $0x18] sm:$0xff]  ;;  %508 = vmatprep.subr.bf16.mxu1 %v717_v12  ;;  %v173_v16 = vld [vmem:[#allocation9 + $0x20] sm:$0xff]  ;;  %v174_v17 = vld [vmem:[#allocation9 + $0x28] sm:$0xff]  ;;  %s375_s30 = sld [smem:[#allocation12 + $0x1]]  ;;  %vm718_vm1 = vmmov 0   ;;  %v719_v45 = vmov 0.0  }
  0x6b   :  { %v114_v6 = vsel %vm113_vm0, %v112_v3, 0.0  ;;  %v135_v7 = vsel %vm113_vm0, %v134_v5, 0.0  ;;  %v124_v8 = vsel %vm113_vm0, %v123_v4, 0.0  ;;  %v488_v15 = vpack.c.bf16 %v172_v14, %v171_v11  ;;  %v175_v19 = vld [vmem:[#allocation9 + $0x30] sm:$0xff]  ;;  %v176_v20 = vld [vmem:[#allocation9 + $0x38] sm:$0xff]  ;;  %v177_v22 = vld [vmem:[#allocation9 + $0x40] sm:$0xff]  ;;  %446 = vmatprep.mubr.msk.f32.mxu0 %vm718_vm1, %v719_v45  ;;  %481 = vmatprep.mubr.msk.f32.mxu1 %vm718_vm1, %v719_v45 }
  0x6c   :  { %115 = vadd.xlane.f32.xlu0 %v114_v6  ;;  %136 = vadd.xlane.f32.xlu1 %v135_v7  ;;  %v491_v18 = vpack.c.bf16 %v174_v17, %v173_v16  ;;  %v494_v21 = vpack.c.bf16 %v176_v20, %v175_v19  ;;  %v178_v23 = vld [vmem:[#allocation9 + $0x48] sm:$0xff]  ;;  %v179_v25 = vld [vmem:[#allocation9 + $0x50] sm:$0xff]  ;;  %v180_v26 = vld [vmem:[#allocation9 + $0x58] sm:$0xff]  ;;  %s720_s14 = smov 96   ;;  %vm165_vm2 = vcmask 523264   ;;  %vm167_vm3 = vcmask 785408  }
  0x6d   :  { %486 = vmatpush3.bf16.msra.mxu0 %v485_v13  ;;  %v497_v24 = vpack.c.bf16 %v178_v23, %v177_v22  ;;  %v500_v27 = vpack.c.bf16 %v180_v26, %v179_v25  ;;  %v181_v28 = vld [vmem:[#allocation9 + $0x60] sm:$0xff]  ;;  %v182_v29 = vld [vmem:[#allocation9 + $0x68] sm:$0xff]  ;;  %v183_v31 = vld [vmem:[#allocation9 + $0x70] sm:$0xff]  ;;  %s721_s18 = smov [#allocation13]  }
  0x6e   :  { %487 = vmatprep.subr.bf16.mxu0 %v717_v12  ;;  %v503_v30 = vpack.c.bf16 %v182_v29, %v181_v28  ;;  %v184_v32 = vld [vmem:[#allocation9 + $0x78] sm:$0xff]  ;;  %v263_v48 = vld [vmem:[#allocation11] sm:$0xff]  ;;  %v264_v49 = vld [vmem:[#allocation11 + $0x8] sm:$0xff]  ;;  %s363_s19 = sshll.u32 %s721_s18, 4  ;;  %s364_s19 = int_to_ptr.vmem [resolvable:$true] %s363_s19 }
  0x6f   :  { %v506_v33 = vpack.c.bf16 %v184_v32, %v183_v31  ;;  %v119_v41 = vstv %s111_s10  ;;  %v140_v42 = vstv %s376_s29  ;;  %v265_v50 = vld [vmem:[#allocation11 + $0x10] sm:$0xff]  ;;  %v509_v52 = vpack.c.bf16 %v264_v49, %v263_v48  ;;  %v266_v53 = vld [vmem:[#allocation11 + $0x18] sm:$0xff]  ;;  %v267_v59 = vld [vmem:[#allocation11 + $0x20] sm:$0xff]  ;;  %s675_s20 = scalar_lea.vmem %s364_s19, 128  ;;  %p680_p4 = scmp.lt.s32.totalorder %s364_s19, %s364_s19 }
  0x70   :  { %125 = vadd.xlane.f32.xlu0 %v124_v8  ;;  %v129_v44 = vstv %s375_s30  ;;  %v512_v55 = vpack.c.bf16 %v266_v53, %v265_v50  ;;  %v268_v60 = vld [vmem:[#allocation11 + $0x28] sm:$0xff]  ;;  %v269_v4 = vld [vmem:[#allocation11 + $0x30] sm:$0xff]  ;;  %v270_v5 = vld [vmem:[#allocation11 + $0x38] sm:$0xff]  ;;  %p676_p3 = scmp.ne.s32.totalorder %s364_s19, %s675_s20  ;;  %p681_p5 = scmp.lt.s32.totalorder %s675_s20, %s675_s20 }
  0x71   :  { %489 = vmatpush3.bf16.msra.mxu0 %v488_v15  ;;  %510 = vmatpush3.bf16.msra.mxu1 %v509_v52  ;;  %v377_v62 = vld [vmem:[%s915_s8] ss:$0 sm:$0xff]  ;;  %v515_v63 = vpack.c.bf16 %v268_v60, %v267_v59  ;;  %v273_v9 = vld [vmem:[#allocation11 + $0x50] sm:$0xff]  ;;  %v274_v10 = vld [vmem:[#allocation11 + $0x58] sm:$0xff] }
  0x72   :  { %490 = vmatprep.subr.bf16.mxu0 %v717_v12  ;;  %511 = vmatprep.subr.bf16.mxu1 %v717_v12  ;;  %v272_v7 = vld [vmem:[#allocation11 + $0x48] sm:$0xff]  ;;  %v524_v11 = vpack.c.bf16 %v274_v10, %v273_v9  ;;  %v275_v13 = vld [vmem:[#allocation11 + $0x60] sm:$0xff]  ;;  %v277_v22 = vld [vmem:[#allocation11 + $0x70] sm:$0xff]  ;;  %p682_p6 = por %p681_p5, %p680_p4 }
  0x73   :  { %v276_v14 = vld [vmem:[#allocation11 + $0x68] sm:$0xff]  ;;  %v278_v23 = vld [vmem:[#allocation11 + $0x78] sm:$0xff] }
  0x74   :  { %v527_v15 = vpack.c.bf16 %v276_v14, %v275_v13  ;;  %v378_v25 = vld [vmem:[%s911_s4] ss:$0 sm:$0xff]  ;;  %p683_p7 = pnand %p682_p6, %p676_p3 }
  0x75   :  { %492 = vmatpush3.bf16.msra.mxu0 %v491_v18  ;;  %513 = vmatpush3.bf16.msra.mxu1 %v512_v55 }
  0x76   :  { %493 = vmatprep.subr.bf16.mxu0 %v717_v12  ;;  %514 = vmatprep.subr.bf16.mxu1 %v717_v12 }
  0x79   :  { %495 = vmatpush3.bf16.msra.mxu0 %v494_v21  ;;  %516 = vmatpush3.bf16.msra.mxu1 %v515_v63 }
  0x7a   :  { %496 = vmatprep.subr.bf16.mxu0 %v717_v12  ;;  %517 = vmatprep.subr.bf16.mxu1 %v717_v12 }
  0x7d   :  { %153 = vrot.lane.b32.xlu1 %v850_v1, %s715_s5  ;;  %498 = vmatpush3.bf16.msra.mxu0 %v497_v24  ;;  %v530_v24 = vpack.c.bf16 %v278_v23, %v277_v22 }
  0x7e   :  { %499 = vmatprep.subr.bf16.mxu0 %v717_v12 }
  0x81   :  { %501 = vmatpush3.bf16.msra.mxu0 %v500_v27 }
  0x82   :  { %502 = vmatprep.subr.bf16.mxu0 %v717_v12 }
  0x85   :  { %504 = vmatpush3.bf16.msra.mxu0 %v503_v30 }
  0x86   :  { %157 = vrot.lane.b32.xlu0 %v852_v2, %s716_s1  ;;  %505 = vmatprep.subr.bf16.mxu0 %v717_v12 }
  0x89   :  { %507 = vmatpush3.bf16.msra.mxu0 %v506_v33 }
  0xf9   :  { %v116_v34 = vpop.xlane.xlu0 %115  ;;  %v137_v35 = vpop.xlane.xlu1 %136 }
  0xfa   :  { %v117_v36 = vmax.f32 %v116_v34, 1e-24  ;;  %v138_v37 = vmax.f32 %v137_v35, 1e-24 }
  0xfc   :  { %547 = vrsqrt.f32 %v117_v36 }
  0xfd   :  { %v126_v38 = vpop.xlane.xlu0 %125  ;;  %549 = vrsqrt.f32 %v138_v37  ;;  %v154_v16 = vpop.permute.xlu1 %153 }
  0xfe   :  { %v127_v39 = vmax.f32 %v126_v38, 1e-24  ;;  %v164_v17 = vsel %vm113_vm0, %v848_v0, %v154_v16 }
 0x100   :  { %551 = vrsqrt.f32 %v127_v39 }
 0x101   :  { %v158_v18 = vpop.permute.xlu0 %157 }
 0x102   :  { %v166_v19 = vsel %vm165_vm2, %v164_v17, %v158_v18 }
 0x106   :  { %v548_v40 = vpop.eup %547 }
 0x107   :  { %v550_v43 = vpop.eup %549  ;;  %v120_v46 = vmul.f32 %v548_v40, %v119_v41 }
 0x108   :  { %v141_v47 = vmul.f32 %v550_v43, %v140_v42 }
 0x109   :  { %v121_v56 = vmul.f32 %v120_v46, %v848_v0  ;;  %v379_v0 = vld [vmem:[%s913_s6] ss:$0 sm:$0xff] }
 0x10a   :  { %v552_v51 = vpop.eup %551  ;;  %v142_v58 = vmul.f32 %v141_v47, %v852_v2  ;;  %v271_v2 = vld [vmem:[#allocation11 + $0x40] sm:$0xff] }
 0x10b   :  { %v130_v54 = vmul.f32 %v552_v51, %v129_v44  ;;  %v521_v8 = vpack.c.bf16 %v272_v7, %v271_v2 }
 0x10d   :  { %v131_v57 = vmul.f32 %v130_v54, %v850_v1  ;;  %v518_v1 = vpack.c.bf16 %v270_v5, %v269_v4 }
 0x10f   :  { %v132_v61 = vadd.f32 %v131_v57, %v121_v56  ;;  %519 = vmatpush3.bf16.msra.mxu1 %v518_v1 }
 0x110   :  { %520 = vmatprep.subr.bf16.mxu1 %v717_v12 }
 0x111   :  { %v143_v3 = vadd.f32 %v142_v58, %v132_v61 }
 0x113   :  { %v151_v6 = vadd.f32 %v377_v62, %v143_v3  ;;  %522 = vmatpush3.bf16.msra.mxu1 %v521_v8 }
 0x114   :  { %523 = vmatprep.subr.bf16.mxu1 %v717_v12 }
 0x115   :  { %161 = vrot.lane.b32.xlu1 %v151_v6, %s720_s14 }
 0x117   :  { %525 = vmatpush3.bf16.msra.mxu1 %v524_v11 }
 0x118   :  { %526 = vmatprep.subr.bf16.mxu1 %v717_v12 }
 0x11b   :  { %528 = vmatpush3.bf16.msra.mxu1 %v527_v15 }
 0x11c   :  { %529 = vmatprep.subr.bf16.mxu1 %v717_v12 }
 0x11f   :  { %531 = vmatpush3.bf16.msra.mxu1 %v530_v24 }
 0x187   :  { %v162_v20 = vpop.permute.xlu1 %161 }
 0x188   :  { %v168_v21 = vsel %vm167_vm3, %v166_v19, %v162_v20 }
 0x189   :  { %447 = vmatmul.mubr.f32.vlgmr.msra.gmra.mrb[0].mxu0 %v168_v21 }
 0x25c   :  { %v258_v12 = vpop.f32.mrb[0].mxu0 }
 0x25d   :  { %v259_v26 = vadd.f32 %v378_v25, %v258_v12  ;;  %v448_v27 = vpop.f32.mrb[1].mxu0 }
 0x25f   :  { %v262_v28 = vmax.f32 %v259_v26, 0.0 }
 0x261   :  { %482 = vmatmul.mubr.f32.vlgmr.msra.gmra.mrb[0].mxu1 %v262_v28 }
 0x334   :  { %v352_v29 = vpop.f32.mrb[0].mxu1 }
 0x335   :  { %v353_v30 = vadd.f32 %v379_v0, %v352_v29  ;;  %v483_v31 = vpop.f32.mrb[1].mxu1 }
 0x337   :  { %356 = vst [vmem:[#allocation13] sm:$0xff] %v353_v30 }
 0x338   :  { %686 = shalt.err (!%p683_p7)
}
 0x339   :  { %s687_s22 = scalar_lea.hbm %s916_s9, 128 }
 0x33a   :  { %p688_p8 = scmp.ne.s32.totalorder %s916_s9, %s687_s22  ;;  %p691_p9 = scmp.lt.u32.totalorder %s687_s22, %s916_s9 }
 0x33c   :  { %p693_p10 = pnand %p691_p9, %p688_p8 }
 0x33e   :  { %696 = shalt.err (!%p693_p10)
}
 0x33f   :  { %366 = dma.vmem_to_hbm [thread:$0]  %s364_s19, 128, %s916_s9, [#allocation4]  }
 0x340   :  { %705 = dma.done.wait [#allocation4], 128  }
 0x341   :  { %706 = vsyncadd [#allocation4], 4294967168 }
 0x342   :  { %370 = vsyncpa [#allocation3], 1 }
 0x343   :  { %371 = vsyncpa [#allocation7], 1 }
 0x344   :  { %372 = vsyncpa [#allocation10], 1 }
 0x345   :  { %373 = vsyncpa [#allocation4], 1 }
 0x346   :  { %374 = vsyncpa [#allocation5], 1 }

</bundles_post_ra>
